<compile_context>
chip_gen: v7x
topology: tpu7x:2x2x1
jax: 0.10.0
libtpu: 0.0.40
codegen_flags: <defaults>
</compile_context>

<pallas_src>
import functools

import jax
import jax.numpy as jnp
from jax.experimental import pallas as pl
from jax.experimental.pallas import tpu as pltpu


def _cdiv(a, b):
    return -(-a // b)


def _round_up(a, b):
    return _cdiv(a, b) * b


def poglm_forward_kernel(x_ref, wt_ref, b_ref, o_ref):
    # x_ref : (tm, Np) tile of packed input rows
    # wt_ref: (Np, Np) block-diagonal W^T (resident across the grid)
    # b_ref : (1, Np)  tiled bias (f32)
    z = jnp.dot(x_ref[...], wt_ref[...], preferred_element_type=jnp.float32)
    z = z + b_ref[...]                      # f32 epilogue (broadcast over rows)
    e = jnp.exp(-z)                         # EUP transcendental
    o_ref[...] = pl.reciprocal(1.0 + e, approx=False).astype(o_ref.dtype)


def prepare_poglm_linear(weight, bias):
    """Build lane-dense linear params ONCE per weight (hoisted off call path).

    weight: (N, N) nn.Linear layout (out x in); bias: (N,).
    Returns a dict with the block-diagonal W^T, tiled bias and packing info.
    """
    N = weight.shape[0]
    if N <= 128:
        # pad N to the smallest divisor of 128 (power of two) >= N
        n_pad = 1
        while n_pad < N:
            n_pad *= 2
        pack = 128 // n_pad
        Np = 128
    else:
        n_pad = _round_up(N, 128)
        pack = 1
        Np = n_pad

    wt = weight.T                                   # (in, out)
    if n_pad != N:
        wt = jnp.pad(wt, ((0, n_pad - N), (0, n_pad - N)))
        bias = jnp.pad(bias, (0, n_pad - N))
    if pack > 1:
        # (Np, Np) block-diagonal: pack copies of W^T on the diagonal
        wt = jnp.kron(jnp.eye(pack, dtype=wt.dtype), wt)
    b = jnp.tile(bias.reshape(1, n_pad), (1, pack)).astype(jnp.float32)
    return {"wt": wt, "b": b, "N": N, "N_pad": n_pad, "pack": pack, "Np": Np}


def poglm_forward(convolved_spikes_list, params, *, tm=8192, min_grid=4,
                  out_dtype=jnp.float32):
    """Pallas equivalent of POGLM.forward.

    convolved_spikes_list: (n_samples, n_time_bins, n_neurons)
    params: output of prepare_poglm_linear(weight, bias)
    returns firing rates, same shape as input, dtype out_dtype (default f32).
    """
    S, T, N = convolved_spikes_list.shape
    assert N == params["N"], "input last dim must match the prepared weight"
    pack, Np, N_pad = params["pack"], params["Np"], params["N_pad"]

    M = S * T
    Mp = _cdiv(M, pack)                      # packed logical rows

    # Row-tile sizing: big tiles (amortize per-step overhead) but keep the
    # grid >= min_grid steps where possible so both v7x TCs get work and the
    # DMA pipeline stays busy.  Multiple of 16 covers bf16 sublane packing.
    tm_eff = min(tm, max(16, _round_up(_cdiv(Mp, min_grid), 16)))
    Mp_pad = _round_up(Mp, tm_eff)
    grid = (Mp_pad // tm_eff,)
    M_total = Mp_pad * pack                  # unpacked rows after padding

    x = convolved_spikes_list.reshape(M, N)
    # Single merged pad (pack padding + tile padding + optional N padding);
    # no pad at all when the shapes already divide.  No standalone dtype cast.
    if M_total != M or N_pad != N:
        x = jnp.pad(x, ((0, M_total - M), (0, N_pad - N)))
    xp = x.reshape(Mp_pad, Np)

    wt = params["wt"]
    if wt.dtype != xp.dtype:
        wt = wt.astype(xp.dtype)             # tiny (Np x Np); negligible
    b = params["b"]

    # Explicit scoped-VMEM budget: 2x double-buffered (tm, Np) in/out tiles
    # plus the resident weight/bias.  >= 32 MiB so v5e's 16 MiB default does
    # not block big tiles; well within v7x's 64 MiB physical VMEM.
    in_bytes = xp.dtype.itemsize
    out_bytes = jnp.dtype(out_dtype).itemsize
    vmem_need = (2 * tm_eff * Np * (in_bytes + out_bytes)
                 + 2 * (Np * Np * wt.dtype.itemsize + Np * 4))
    vmem_limit = int(max(vmem_need + (4 << 20), 32 << 20))

    out = pl.pallas_call(
        poglm_forward_kernel,
        out_shape=jax.ShapeDtypeStruct((Mp_pad, Np), out_dtype),
        grid_spec=pltpu.PrefetchScalarGridSpec(
            num_scalar_prefetch=0,
            grid=grid,
            in_specs=[
                pl.BlockSpec((tm_eff, Np), lambda i: (i, 0)),   # packed rows
                pl.BlockSpec((Np, Np), lambda i: (0, 0)),       # block-diag W^T
                pl.BlockSpec((1, Np), lambda i: (0, 0)),        # tiled bias
            ],
            out_specs=pl.BlockSpec((tm_eff, Np), lambda i: (i, 0)),
        ),
        compiler_params=pltpu.CompilerParams(
            dimension_semantics=("parallel",),   # shard rows over v7x's 2 TCs
            vmem_limit_bytes=vmem_limit,
        ),
    )(xp, wt, b)

    # Unpack: free reshape of the contiguous buffer; a single slice only when
    # padding was actually applied (no extra HBM pass in the aligned case).
    out = out.reshape(M_total, N_pad)
    if M_total != M or N_pad != N:
        out = out[:M, :N]
    return out.reshape(S, T, N)


if __name__ == "__main__":
    # Deterministic parameter / input construction (no checkpoint loading).
    # Module config: n_neurons=32 (n_vis_neurons=24, n_hid_neurons=8);
    # basis/window_size only matter for sample(), not forward().
    n_neurons = 32
    n_samples = 2
    n_time_bins = 8

    key = jax.random.PRNGKey(0)
    k_x, k_w, k_b, k_x2 = jax.random.split(key, 4)

    # Mimic nn.Linear default init: U(-1/sqrt(fan_in), 1/sqrt(fan_in))
    bound = 1.0 / jnp.sqrt(jnp.float32(n_neurons))
    weight = jax.random.uniform(k_w, (n_neurons, n_neurons),
                                minval=-bound, maxval=bound, dtype=jnp.float32)
    bias = jax.random.uniform(k_b, (n_neurons,),
                              minval=-bound, maxval=bound, dtype=jnp.float32)

    # Built once per weight, reused across forward calls (per review).
    params = prepare_poglm_linear(weight, bias)

    def ref_forward(x):
        return jax.nn.sigmoid(jnp.einsum("stn,mn->stm", x, weight) + bias)

    fwd = jax.jit(functools.partial(poglm_forward, params=params))

    # --- test 1: small problem, default big-tile path ---
    x1 = jax.random.normal(k_x, (n_samples, n_time_bins, n_neurons),
                           dtype=jnp.float32)
    fr1 = jax.block_until_ready(fwd(x1))
    assert fr1.shape == (n_samples, n_time_bins, n_neurons)
    assert jnp.allclose(fr1, ref_forward(x1), atol=1e-5, rtol=1e-5)

    # --- test 2: multi-tile path (grid > 1) with ragged row count ---
    x2 = jax.random.normal(k_x2, (3, 100, n_neurons), dtype=jnp.float32)
    fr2 = jax.block_until_ready(poglm_forward(x2, params, tm=16))
    assert fr2.shape == (3, 100, n_neurons)
    assert jnp.allclose(fr2, ref_forward(x2), atol=1e-5, rtol=1e-5)

    # --- test 3: optional bf16 output stream (halves output HBM traffic) ---
    fr3 = jax.block_until_ready(
        poglm_forward(x1, params, out_dtype=jnp.bfloat16))
    assert jnp.allclose(fr3.astype(jnp.float32), ref_forward(x1),
                        atol=1e-2, rtol=1e-2)

    # TODO(synk): sample() / sample_exact_distribution() /
    # complete_log_likelihood() involve sequential Poisson sampling loops and
    # distribution-specific likelihoods; only forward() is implemented here.
    print("KERNEL_OK")
</pallas_src>

<mosaic_0001>
module attributes {stable_mosaic.version = 11 : i64} {
  func.func @poglm_forward_kernel(%arg0: i32, %arg1: memref<16x128xf32, #tpu.memory_space<vmem>>, %arg2: memref<128x128xf32, #tpu.memory_space<vmem>>, %arg3: memref<1x128xf32, #tpu.memory_space<vmem>>, %arg4: memref<16x128xf32, #tpu.memory_space<vmem>>) attributes {dimension_semantics = [#tpu.dimension_semantics<parallel>], iteration_bounds = array<i64: 1>, scalar_prefetch = 0 : i64, scratch_operands = 0 : i64, tpu.core_type = #tpu.core_type<tc>, window_params = [{transform_indices = @transform_0, window_bounds = array<i64: 16, 128>}, {pipeline_mode = #tpu.pipeline_mode<synchronous>, transform_indices = @transform_1, window_bounds = array<i64: 128, 128>}, {pipeline_mode = #tpu.pipeline_mode<synchronous>, transform_indices = @transform_2, window_bounds = array<i64: 1, 128>}, {transform_indices = @transform_3, window_bounds = array<i64: 16, 128>}]} {
    %c0 = arith.constant 0 : index
    %c0_0 = arith.constant 0 : index
    %0 = vector.load %arg1[%c0, %c0_0] : memref<16x128xf32, #tpu.memory_space<vmem>>, vector<16x128xf32>
    %c0_1 = arith.constant 0 : index
    %c0_2 = arith.constant 0 : index
    %1 = vector.load %arg2[%c0_1, %c0_2] : memref<128x128xf32, #tpu.memory_space<vmem>>, vector<128x128xf32>
    %cst = arith.constant dense<0.000000e+00> : vector<16x128xf32>
    %2 = tpu.matmul %0, %1, %cst {dimension_numbers = #tpu.dot_dimension_numbers<[1], [0], [0], [1], [0, 0, 1, 1], [], []>} : vector<16x128xf32>, vector<128x128xf32>, vector<16x128xf32> -> vector<16x128xf32>
    %c0_3 = arith.constant 0 : index
    %c0_4 = arith.constant 0 : index
    %3 = vector.load %arg3[%c0_3, %c0_4] : memref<1x128xf32, #tpu.memory_space<vmem>>, vector<1x128xf32>
    %4 = vector.broadcast %3 : vector<1x128xf32> to vector<16x128xf32>
    %5 = arith.addf %2, %4 : vector<16x128xf32>
    %cst_5 = arith.constant 0.000000e+00 : f32
    %6 = vector.broadcast %cst_5 : f32 to vector<16x128xf32>
    %7 = arith.subf %6, %5 : vector<16x128xf32>
    %8 = math.exp %7 : vector<16x128xf32>
    %cst_6 = arith.constant 1.000000e+00 : f32
    %9 = vector.broadcast %cst_6 : f32 to vector<16x128xf32>
    %10 = arith.addf %9, %8 : vector<16x128xf32>
    %11 = tpu.reciprocal %10 : vector<16x128xf32> -> vector<16x128xf32>
    %c0_7 = arith.constant 0 : index
    %c0_8 = arith.constant 0 : index
    %12 = vector.load %arg4[%c0_7, %c0_8] : memref<16x128xf32, #tpu.memory_space<vmem>>, vector<16x128xf32>
    tpu.vector_store %arg4[%c0_7, %c0_8], %11 {strides = array<i32>} : memref<16x128xf32, #tpu.memory_space<vmem>>, vector<16x128xf32>,
    return
  }
  func.func @transform_0(%arg0: i32) -> (i32, i32) {
    %c0_i32 = arith.constant 0 : i32
    %c0_i32_0 = arith.constant 0 : i32
    return %arg0, %c0_i32 : i32, i32
  }
  func.func @transform_1(%arg0: i32) -> (i32, i32) {
    %c0_i32 = arith.constant 0 : i32
    %c0_i32_0 = arith.constant 0 : i32
    %c0_i32_1 = arith.constant 0 : i32
    return %c0_i32, %c0_i32_0 : i32, i32
  }
  func.func @transform_2(%arg0: i32) -> (i32, i32) {
    %c0_i32 = arith.constant 0 : i32
    %c0_i32_0 = arith.constant 0 : i32
    %c0_i32_1 = arith.constant 0 : i32
    return %c0_i32, %c0_i32_0 : i32, i32
  }
  func.func @transform_3(%arg0: i32) -> (i32, i32) {
    %c0_i32 = arith.constant 0 : i32
    %c0_i32_0 = arith.constant 0 : i32
    return %arg0, %c0_i32 : i32, i32
  }
}

</mosaic_0001>

<bundles_post_ra>
// kernel: poglm_forward.1
= control target key start
LH: loop header
LB: loop body
LE: loop exit
PB: predicated region body
PF: predicated region fallthrough
CT: control target
= control target key end

     0   :  { %s307_s1 = inlined_call_operand.vmem [shape: f32[128,128], index: 1, kind: input, shape index: {}]   ;;  %s308_s0 = inlined_call_operand.vmem [shape: f32[16,128], index: 0, kind: input, shape index: {}]   ;;  %s309_s2 = inlined_call_operand.vmem [shape: f32[1,128], index: 2, kind: input, shape index: {}]   ;;  %s310_s3 = inlined_call_operand.vmem [shape: f32[16,128], index: 3, kind: output, shape index: {}]  }
   0x1   :  { %v16_v0 = vld [vmem:[%s307_s1] sm:$0xff]  ;;  %v17_v1 = vld [vmem:[%s307_s1 + $0x8] sm:$0xff]  ;;  %v18_v2 = vld [vmem:[%s307_s1 + $0x10] sm:$0xff] }
   0x2   :  { %v184_v3 = vpack.c.bf16 %v17_v1, %v16_v0  ;;  %v19_v4 = vld [vmem:[%s307_s1 + $0x18] sm:$0xff]  ;;  %v20_v6 = vld [vmem:[%s307_s1 + $0x20] sm:$0xff]  ;;  %v21_v7 = vld [vmem:[%s307_s1 + $0x28] sm:$0xff] }
   0x3   :  { %v188_v5 = vpack.c.bf16 %v19_v4, %v18_v2  ;;  %v192_v8 = vpack.c.bf16 %v21_v7, %v20_v6  ;;  %v14_v9 = vld [vmem:[%s308_s0] sm:$0xff]  ;;  %v22_v10 = vld [vmem:[%s307_s1 + $0x30] sm:$0xff]  ;;  %v23_v11 = vld [vmem:[%s307_s1 + $0x38] sm:$0xff] }
   0x4   :  { %185 = vmatprep.subr.bf16.mxu0 %v184_v3  ;;  %181 = vmatprep.mubr.f32.mxu0 %v14_v9  ;;  %v196_v12 = vpack.c.bf16 %v23_v11, %v22_v10  ;;  %v24_v13 = vld [vmem:[%s307_s1 + $0x40] sm:$0xff]  ;;  %v25_v14 = vld [vmem:[%s307_s1 + $0x48] sm:$0xff]  ;;  %v26_v16 = vld [vmem:[%s307_s1 + $0x50] sm:$0xff] }
   0x5   :  { %187 = vmatpush3.bf16.msra.mxu0 %v184_v3  ;;  %v200_v15 = vpack.c.bf16 %v25_v14, %v24_v13  ;;  %v27_v17 = vld [vmem:[%s307_s1 + $0x58] sm:$0xff]  ;;  %v28_v19 = vld [vmem:[%s307_s1 + $0x60] sm:$0xff]  ;;  %v29_v20 = vld [vmem:[%s307_s1 + $0x68] sm:$0xff] }
   0x6   :  { %189 = vmatprep.subr.bf16.mxu0 %v188_v5  ;;  %v204_v18 = vpack.c.bf16 %v27_v17, %v26_v16  ;;  %v208_v21 = vpack.c.bf16 %v29_v20, %v28_v19  ;;  %v30_v22 = vld [vmem:[%s307_s1 + $0x70] sm:$0xff]  ;;  %v31_v23 = vld [vmem:[%s307_s1 + $0x78] sm:$0xff]  ;;  %v15_v25 = vld [vmem:[%s308_s0 + $0x8] sm:$0xff] }
   0x7   :  { %v212_v24 = vpack.c.bf16 %v31_v23, %v30_v22  ;;  %v130_v26 = vld [vmem:[%s309_s2] ss:$0 sm:$0xff] }
   0x9   :  { %191 = vmatpush3.bf16.msra.mxu0 %v188_v5 }
   0xa   :  { %193 = vmatprep.subr.bf16.mxu0 %v192_v8 }
   0xd   :  { %195 = vmatpush3.bf16.msra.mxu0 %v192_v8 }
   0xe   :  { %197 = vmatprep.subr.bf16.mxu0 %v196_v12 }
  0x11   :  { %199 = vmatpush3.bf16.msra.mxu0 %v196_v12 }
  0x12   :  { %201 = vmatprep.subr.bf16.mxu0 %v200_v15 }
  0x15   :  { %203 = vmatpush3.bf16.msra.mxu0 %v200_v15 }
  0x16   :  { %205 = vmatprep.subr.bf16.mxu0 %v204_v18 }
  0x19   :  { %207 = vmatpush3.bf16.msra.mxu0 %v204_v18 }
  0x1a   :  { %209 = vmatprep.subr.bf16.mxu0 %v208_v21 }
  0x1d   :  { %211 = vmatpush3.bf16.msra.mxu0 %v208_v21 }
  0x1e   :  { %213 = vmatprep.subr.bf16.mxu0 %v212_v24 }
  0x21   :  { %215 = vmatpush3.bf16.msra.mxu0 %v212_v24 }
  0x24   :  { %182 = vmatmul.mubr.f32.vlgmr.msra.gmra.mrb[0].mxu0 %v15_v25 }
  0xf7   :  { %v183_v27 = vpop.f32.mrb[0].mxu0 }
  0xf8   :  { %v111_v28 = vadd.f32 %v183_v27, %v130_v26  ;;  %v105_v29 = vpop.f32.mrb[1].mxu0 }
  0xf9   :  { %v106_v30 = vadd.f32 %v130_v26, %v105_v29 }
  0xfa   :  { %v115_v31 = vsub.f32 0.0, %v111_v28 }
  0xfb   :  { %v114_v32 = vsub.f32 0.0, %v106_v30 }
  0xfc   :  { %v118_v33 = vmul.f32 1.442695, %v115_v31 }
  0xfd   :  { %v116_v34 = vmul.f32 1.442695, %v114_v32 }
  0xfe   :  { %216 = vpow2.f32 %v118_v33 }
  0xff   :  { %218 = vpow2.f32 %v116_v34 }
 0x108   :  { %v217_v35 = vpop.eup %216 }
 0x109   :  { %v219_v36 = vpop.eup %218  ;;  %v121_v37 = vadd.f32 1.0, %v217_v35 }
 0x10a   :  { %v120_v38 = vadd.f32 1.0, %v219_v36 }
 0x10b   :  { %220 = vrcp.f32 %v121_v37 }
 0x10c   :  { %222 = vrcp.f32 %v120_v38 }
 0x115   :  { %v221_v39 = vpop.eup %220 }
 0x116   :  { %v223_v40 = vpop.eup %222  ;;  %125 = vst [vmem:[%s310_s3 + $0x8] sm:$0xff] %v221_v39 }
 0x117   :  { %124 = vst [vmem:[%s310_s3] sm:$0xff] %v223_v40 }

</bundles_post_ra>
